<compile_context>
chip_gen: v7x
topology: tpu7x:2x2x1
jax: 0.10.0
libtpu: 0.0.40
codegen_flags: <defaults>
</compile_context>

<pallas_src>
import functools
import math
from itertools import accumulate

import numpy as np
import jax
import jax.numpy as jnp
from jax.experimental import pallas as pl
from jax.experimental.pallas import tpu as pltpu


def degree_to_dim(degree: int) -> int:
    return 2 * degree + 1


# ----------------------------- Pallas kernel ------------------------------- #
def _attn_kernel(key_ref, q_ref, v_ref, w_ref, d_ref, dt_ref, b_ref, s_ref,
                 o_ref, *, in_degree):
    # key_ref: (TN, K*HF)  q_ref: (TN, HF)  v_ref: (TN, K*HM)
    # w_ref:   (K*HF, K*H) block indicator with 1/sqrt(HF) folded in
    # d_ref:   (K*H, H)    per-head K-sum indicator;  dt_ref = d_ref.T
    # b_ref:   (K*H, K*HM) prob -> value-lane broadcast indicator
    # s_ref:   (K*HM, HM)  K-sum indicator
    # o_ref:   (TN, HM)
    f32 = jnp.float32
    K = in_degree

    q = q_ref[...].astype(f32)                               # (TN, HF)
    # Lane-replicate q across the K incoming edges (concat along lanes; cheap
    # and done once per tile — avoids K-fold extra HBM traffic for q).
    q_rep = jnp.concatenate([q] * K, axis=-1)                # (TN, K*HF)

    # e_dot_v for all (edge, head) pairs: one dense VPU multiply, then the
    # F-reduction on the MXU against the block-indicator matrix.
    kq = key_ref[...] * q_rep                                # (TN, K*HF) f32
    logits = jnp.dot(kq, w_ref[...],
                     preferred_element_type=f32)             # (TN, K*H) h-major, k-minor

    # edge_softmax over the K incoming edges, packed across heads.
    # Row-max stabilization is exact per head (shift invariance of softmax);
    # the clamp only guards f32 underflow for pathological cross-head spreads.
    m = jnp.max(logits, axis=-1, keepdims=True)              # (TN, 1)
    p = jnp.exp(jnp.maximum(logits - m, -80.0))              # (TN, K*H) one EUP pass
    denom = jnp.dot(p, d_ref[...],
                    preferred_element_type=f32)              # (TN, H)   MXU K-sum
    rden = pl.reciprocal(denom, approx=True)                 # (TN, H)   EUP
    pn = p * jnp.dot(rden, dt_ref[...],
                     preferred_element_type=f32)             # (TN, K*H) normalized

    # copy_e_sum: broadcast probs into value lanes via MXU, one dense VPU
    # multiply, then the K-reduction on the MXU.
    w_rep = jnp.dot(pn, b_ref[...],
                    preferred_element_type=f32)              # (TN, K*HM)
    weighted = v_ref[...] * w_rep                            # (TN, K*HM) f32
    out = jnp.dot(weighted, s_ref[...],
                  preferred_element_type=f32)                # (TN, HM)
    o_ref[...] = out.astype(o_ref.dtype)


# ------------------------------ host-side glue ------------------------------ #
def _preprocess(value_fused, key_fused, query, *, num_heads, key_fiber,
                value_fiber, n_nodes, in_degree):
    H, N, K = num_heads, n_nodes, in_degree

    key_degrees = sorted(d for d, _ in key_fiber)
    HF = sum(c * degree_to_dim(d) for d, c in key_fiber)     # total key features
    assert HF % H == 0
    F = HF // H

    C = value_fused.shape[1]                                 # fused value channels
    D = value_fused.shape[2]                                 # sum of degree dims
    assert C % H == 0
    Cp = C // H
    M = Cp * D
    HM = C * D                                               # == H * M

    # Free, lane-dense 2D reshape views — no HBM transposes (dest-major edges).
    key_b = key_fused.reshape(N, K * HF)                     # (N, K*HF)
    v_b = value_fused.reshape(N, K * HM)                     # (N, K*HM)
    q_cat = jnp.concatenate([query[str(d)] for d in key_degrees], axis=-1)
    q_b = q_cat.reshape(N, HF)                               # (N, HF)

    scale = 1.0 / math.sqrt(HF)
    meta = (N, H, Cp, D, C, M, K, F, HF, HM)
    return key_b, q_b, v_b, scale, meta


def _indicator_mats(H, K, F, M, scale):
    """Static block-indicator matrices that drive the MXU reductions."""
    HF, HM, KH = H * F, H * M, K * H
    w = np.zeros((K * HF, KH), np.float32)
    for k in range(K):
        for h in range(H):
            w[k * HF + h * F: k * HF + (h + 1) * F, h * K + k] = scale
    d = np.zeros((KH, H), np.float32)
    for h in range(H):
        d[h * K:(h + 1) * K, h] = 1.0
    dt = np.ascontiguousarray(d.T)
    b = np.zeros((KH, K * HM), np.float32)
    for k in range(K):
        for h in range(H):
            b[h * K + k, k * HM + h * M: k * HM + (h + 1) * M] = 1.0
    s = np.zeros((K * HM, HM), np.float32)
    eye = np.eye(HM, dtype=np.float32)
    for k in range(K):
        s[k * HM:(k + 1) * HM, :] = eye
    return w, d, dt, b, s


def _postprocess(out_flat, meta, value_fiber):
    N, H, Cp, D, C, M, K, F, HF, HM = meta
    feat_out = out_flat.reshape(N, C, D)
    splits = [degree_to_dim(d) for d, _ in sorted(value_fiber)]
    idx = list(accumulate(splits))[:-1]
    pieces = jnp.split(feat_out, idx, axis=-1)
    return {str(d): p for (d, _), p in zip(sorted(value_fiber), pieces)}


def _tpu_kind() -> str:
    try:
        return jax.devices()[0].device_kind.lower()
    except Exception:
        return ""


def attention_se3_forward(value_fused, key_fused, query, *, num_heads, key_fiber,
                          value_fiber, n_nodes, in_degree, tile_rows=1024):
    key_b, q_b, v_b, scale, meta = _preprocess(
        value_fused, key_fused, query, num_heads=num_heads, key_fiber=key_fiber,
        value_fiber=value_fiber, n_nodes=n_nodes, in_degree=in_degree)
    N, H, Cp, D, C, M, K, F, HF, HM = meta
    KH = K * H

    w_np, d_np, dt_np, b_np, s_np = _indicator_mats(H, K, F, M, scale)
    wm, dm, dtm = jnp.asarray(w_np), jnp.asarray(d_np), jnp.asarray(dt_np)
    bm, sm = jnp.asarray(b_np), jnp.asarray(s_np)

    # Per-generation VMEM / pipelining policy.
    kind = _tpu_kind()
    is_v7 = "v7" in kind
    vmem_limit = (32 << 20) if is_v7 else (64 << 20)   # v7x: 64 MiB physical/core
    min_steps = 4 if is_v7 else 2                      # >=2 steps per TC on v7x

    # Tile selection: account for double-buffered inputs/outputs AND the f32
    # in-kernel temporaries (kq, q_rep, w_rep, weighted, packed probs, out).
    itemsize = jnp.dtype(value_fused.dtype).itemsize
    in_row = itemsize * (K * HF + HF + K * HM + HM)
    tmp_row = 4 * (2 * K * HF + 2 * K * HM + HM + 4 * KH + 2 * H)
    bytes_per_row = 2 * in_row + tmp_row
    const_bytes = 2 * 4 * (w_np.size + d_np.size + dt_np.size + b_np.size + s_np.size)
    budget = max(int(vmem_limit * 0.55) - const_bytes, 8 * bytes_per_row)

    cap = max(8, budget // bytes_per_row)
    TN = max(8, (min(tile_rows, cap, max(N, 8)) // 8) * 8)
    while TN > 8 and pl.cdiv(N, TN) < min_steps:
        TN = max(8, ((TN // 2) // 8) * 8)

    N_pad = pl.cdiv(N, TN) * TN
    if N_pad != N:
        pad = N_pad - N
        key_b = jnp.pad(key_b, ((0, pad), (0, 0)))
        q_b = jnp.pad(q_b, ((0, pad), (0, 0)))
        v_b = jnp.pad(v_b, ((0, pad), (0, 0)))

    cost = pl.CostEstimate(
        flops=int(N_pad * (2 * K * HF + 2 * K * HF * KH + 4 * KH * H
                           + 2 * KH * K * HM + 2 * K * HM + 2 * K * HM * HM
                           + 8 * KH)),
        transcendentals=int(N_pad * (KH + H)),
        bytes_accessed=int(itemsize * N_pad * (K * HF + HF + K * HM + HM)
                           + const_bytes))

    out = pl.pallas_call(
        functools.partial(_attn_kernel, in_degree=K),
        out_shape=jax.ShapeDtypeStruct((N_pad, HM), value_fused.dtype),
        grid_spec=pltpu.PrefetchScalarGridSpec(
            num_scalar_prefetch=0,
            grid=(N_pad // TN,),
            in_specs=[
                pl.BlockSpec((TN, K * HF), lambda i: (i, 0)),
                pl.BlockSpec((TN, HF), lambda i: (i, 0)),
                pl.BlockSpec((TN, K * HM), lambda i: (i, 0)),
                pl.BlockSpec((K * HF, KH), lambda i: (0, 0)),
                pl.BlockSpec((KH, H), lambda i: (0, 0)),
                pl.BlockSpec((H, KH), lambda i: (0, 0)),
                pl.BlockSpec((KH, K * HM), lambda i: (0, 0)),
                pl.BlockSpec((K * HM, HM), lambda i: (0, 0)),
            ],
            out_specs=pl.BlockSpec((TN, HM), lambda i: (i, 0)),
        ),
        compiler_params=pltpu.CompilerParams(
            dimension_semantics=("parallel",),
            vmem_limit_bytes=vmem_limit),
        cost_estimate=cost,
    )(key_b, q_b, v_b, wm, dm, dtm, bm, sm)

    return _postprocess(out[:N], meta, value_fiber)


def attention_se3_reference(value_fused, key_fused, query, *, num_heads,
                            key_fiber, value_fiber, n_nodes, in_degree):
    """Pure-JAX reference of the same forward semantics (for verification)."""
    key_b, q_b, v_b, scale, meta = _preprocess(
        value_fused, key_fused, query, num_heads=num_heads, key_fiber=key_fiber,
        value_fiber=value_fiber, n_nodes=n_nodes, in_degree=in_degree)
    N, H, Cp, D, C, M, K, F, HF, HM = meta
    k = key_b.reshape(N, K, H, F).astype(jnp.float32)
    q = q_b.reshape(N, H, F).astype(jnp.float32)
    v = v_b.reshape(N, K, H, M).astype(jnp.float32)
    logits = jnp.einsum('nkhf,nhf->nkh', k, q) * scale
    w = jax.nn.softmax(logits, axis=1)
    out = jnp.einsum('nkh,nkhm->nhm', w, v).reshape(N, HM)
    return _postprocess(out.astype(value_fused.dtype), meta, value_fiber)


# ---------------------------------- main ------------------------------------ #
if __name__ == "__main__":
    H = 2
    key_fiber = [(0, 16), (1, 16)]     # (degree, channels); num_features = 64
    value_fiber = [(0, 16), (1, 16)]   # fused value: (E, 16, 4)
    N, K = 8, 8                        # 8 nodes, fixed in-degree 8 -> E = 64
    E = N * K

    key_num_features = sum(c * degree_to_dim(d) for d, c in key_fiber)
    val_C = value_fiber[0][1]
    val_D = sum(degree_to_dim(d) for d, _ in value_fiber)

    rng = jax.random.PRNGKey(0)
    k1, k2, k3, k4 = jax.random.split(rng, 4)
    key_fused = jax.random.normal(k1, (E, key_num_features), jnp.float32)
    value_fused = jax.random.normal(k2, (E, val_C, val_D), jnp.float32)
    query = {
        '0': jax.random.normal(k3, (N, key_fiber[0][1], degree_to_dim(0)), jnp.float32),
        '1': jax.random.normal(k4, (N, key_fiber[1][1], degree_to_dim(1)), jnp.float32),
    }

    out = attention_se3_forward(
        value_fused, key_fused, query, num_heads=H, key_fiber=key_fiber,
        value_fiber=value_fiber, n_nodes=N, in_degree=K)
    out = jax.block_until_ready(out)

    ref = attention_se3_reference(
        value_fused, key_fused, query, num_heads=H, key_fiber=key_fiber,
        value_fiber=value_fiber, n_nodes=N, in_degree=K)

    # Tolerance accounts for pl.reciprocal(approx=True) in the softmax denom.
    for d in out:
        assert out[d].shape == ref[d].shape
        assert jnp.allclose(out[d], ref[d], atol=2e-3, rtol=2e-3), f"mismatch deg {d}"

    print("KERNEL_OK")
</pallas_src>

<mosaic_0001>
module attributes {stable_mosaic.version = 11 : i64} {
  func.func @_attn_kernel(%arg0: i32, %arg1: memref<8x512xf32, #tpu.memory_space<vmem>>, %arg2: memref<8x64xf32, #tpu.memory_space<vmem>>, %arg3: memref<8x512xf32, #tpu.memory_space<vmem>>, %arg4: memref<512x16xf32, #tpu.memory_space<vmem>>, %arg5: memref<16x2xf32, #tpu.memory_space<vmem>>, %arg6: memref<2x16xf32, #tpu.memory_space<vmem>>, %arg7: memref<16x512xf32, #tpu.memory_space<vmem>>, %arg8: memref<512x64xf32, #tpu.memory_space<vmem>>, %arg9: memref<8x64xf32, #tpu.memory_space<vmem>>) attributes {dimension_semantics = [#tpu.dimension_semantics<parallel>], iteration_bounds = array<i64: 1>, scalar_prefetch = 0 : i64, scratch_operands = 0 : i64, tpu.core_type = #tpu.core_type<tc>, window_params = [{transform_indices = @transform_0, window_bounds = array<i64: 8, 512>}, {transform_indices = @transform_1, window_bounds = array<i64: 8, 64>}, {transform_indices = @transform_2, window_bounds = array<i64: 8, 512>}, {pipeline_mode = #tpu.pipeline_mode<synchronous>, transform_indices = @transform_3, window_bounds = array<i64: 512, 16>}, {pipeline_mode = #tpu.pipeline_mode<synchronous>, transform_indices = @transform_4, window_bounds = array<i64: 16, 2>}, {pipeline_mode = #tpu.pipeline_mode<synchronous>, transform_indices = @transform_5, window_bounds = array<i64: 2, 16>}, {pipeline_mode = #tpu.pipeline_mode<synchronous>, transform_indices = @transform_6, window_bounds = array<i64: 16, 512>}, {pipeline_mode = #tpu.pipeline_mode<synchronous>, transform_indices = @transform_7, window_bounds = array<i64: 512, 64>}, {transform_indices = @transform_8, window_bounds = array<i64: 8, 64>}]} {
    %c0 = arith.constant 0 : index
    %c0_0 = arith.constant 0 : index
    %0 = vector.load %arg2[%c0, %c0_0] : memref<8x64xf32, #tpu.memory_space<vmem>>, vector<8x64xf32>
    %1 = tpu.concatenate %0, %0, %0, %0, %0, %0, %0, %0 in 1 : vector<8x64xf32>, vector<8x64xf32>, vector<8x64xf32>, vector<8x64xf32>, vector<8x64xf32>, vector<8x64xf32>, vector<8x64xf32>, vector<8x64xf32> -> vector<8x512xf32>
    %c0_1 = arith.constant 0 : index
    %c0_2 = arith.constant 0 : index
    %2 = vector.load %arg1[%c0_1, %c0_2] : memref<8x512xf32, #tpu.memory_space<vmem>>, vector<8x512xf32>
    %3 = arith.mulf %2, %1 : vector<8x512xf32>
    %c0_3 = arith.constant 0 : index
    %c0_4 = arith.constant 0 : index
    %4 = vector.load %arg4[%c0_3, %c0_4] : memref<512x16xf32, #tpu.memory_space<vmem>>, vector<512x16xf32>
    %cst = arith.constant dense<0.000000e+00> : vector<8x16xf32>
    %5 = tpu.matmul %3, %4, %cst {dimension_numbers = #tpu.dot_dimension_numbers<[1], [0], [0], [1], [0, 0, 1, 1], [], []>} : vector<8x512xf32>, vector<512x16xf32>, vector<8x16xf32> -> vector<8x16xf32>
    %cst_5 = arith.constant dense<0xFF800000> : vector<8xf32>
    %6 = vector.multi_reduction <maximumf>, %5, %cst_5 [1] : vector<8x16xf32> to vector<8xf32>
    %7 = vector.shape_cast %6 : vector<8xf32> to vector<8x1xf32>
    %8 = vector.broadcast %7 : vector<8x1xf32> to vector<8x16xf32>
    %9 = arith.subf %5, %8 : vector<8x16xf32>
    %cst_6 = arith.constant -8.000000e+01 : f32
    %10 = vector.broadcast %cst_6 : f32 to vector<8x16xf32>
    %11 = arith.maximumf %9, %10 : vector<8x16xf32>
    %12 = math.exp %11 : vector<8x16xf32>
    %c0_7 = arith.constant 0 : index
    %c0_8 = arith.constant 0 : index
    %13 = vector.load %arg5[%c0_7, %c0_8] : memref<16x2xf32, #tpu.memory_space<vmem>>, vector<16x2xf32>
    %cst_9 = arith.constant dense<0.000000e+00> : vector<8x2xf32>
    %14 = tpu.matmul %12, %13, %cst_9 {dimension_numbers = #tpu.dot_dimension_numbers<[1], [0], [0], [1], [0, 0, 1, 1], [], []>} : vector<8x16xf32>, vector<16x2xf32>, vector<8x2xf32> -> vector<8x2xf32>
    %15 = tpu.reciprocal %14 {approx = true} : vector<8x2xf32> -> vector<8x2xf32>
    %c0_10 = arith.constant 0 : index
    %c0_11 = arith.constant 0 : index
    %16 = vector.load %arg6[%c0_10, %c0_11] : memref<2x16xf32, #tpu.memory_space<vmem>>, vector<2x16xf32>
    %cst_12 = arith.constant dense<0.000000e+00> : vector<8x16xf32>
    %17 = tpu.matmul %15, %16, %cst_12 {dimension_numbers = #tpu.dot_dimension_numbers<[1], [0], [0], [1], [0, 0, 1, 1], [], []>} : vector<8x2xf32>, vector<2x16xf32>, vector<8x16xf32> -> vector<8x16xf32>
    %18 = arith.mulf %12, %17 : vector<8x16xf32>
    %c0_13 = arith.constant 0 : index
    %c0_14 = arith.constant 0 : index
    %19 = vector.load %arg7[%c0_13, %c0_14] : memref<16x512xf32, #tpu.memory_space<vmem>>, vector<16x512xf32>
    %cst_15 = arith.constant dense<0.000000e+00> : vector<8x512xf32>
    %20 = tpu.matmul %18, %19, %cst_15 {dimension_numbers = #tpu.dot_dimension_numbers<[1], [0], [0], [1], [0, 0, 1, 1], [], []>} : vector<8x16xf32>, vector<16x512xf32>, vector<8x512xf32> -> vector<8x512xf32>
    %c0_16 = arith.constant 0 : index
    %c0_17 = arith.constant 0 : index
    %21 = vector.load %arg3[%c0_16, %c0_17] : memref<8x512xf32, #tpu.memory_space<vmem>>, vector<8x512xf32>
    %22 = arith.mulf %21, %20 : vector<8x512xf32>
    %c0_18 = arith.constant 0 : index
    %c0_19 = arith.constant 0 : index
    %23 = vector.load %arg8[%c0_18, %c0_19] : memref<512x64xf32, #tpu.memory_space<vmem>>, vector<512x64xf32>
    %cst_20 = arith.constant dense<0.000000e+00> : vector<8x64xf32>
    %24 = tpu.matmul %22, %23, %cst_20 {dimension_numbers = #tpu.dot_dimension_numbers<[1], [0], [0], [1], [0, 0, 1, 1], [], []>} : vector<8x512xf32>, vector<512x64xf32>, vector<8x64xf32> -> vector<8x64xf32>
    %c0_21 = arith.constant 0 : index
    %c0_22 = arith.constant 0 : index
    %25 = vector.load %arg9[%c0_21, %c0_22] : memref<8x64xf32, #tpu.memory_space<vmem>>, vector<8x64xf32>
    tpu.vector_store %arg9[%c0_21, %c0_22], %24 {strides = array<i32>} : memref<8x64xf32, #tpu.memory_space<vmem>>, vector<8x64xf32>,
    return
  }
  func.func @transform_0(%arg0: i32) -> (i32, i32) {
    %c0_i32 = arith.constant 0 : i32
    %c0_i32_0 = arith.constant 0 : i32
    return %arg0, %c0_i32 : i32, i32
  }
  func.func @transform_1(%arg0: i32) -> (i32, i32) {
    %c0_i32 = arith.constant 0 : i32
    %c0_i32_0 = arith.constant 0 : i32
    return %arg0, %c0_i32 : i32, i32
  }
  func.func @transform_2(%arg0: i32) -> (i32, i32) {
    %c0_i32 = arith.constant 0 : i32
    %c0_i32_0 = arith.constant 0 : i32
    return %arg0, %c0_i32 : i32, i32
  }
  func.func @transform_3(%arg0: i32) -> (i32, i32) {
    %c0_i32 = arith.constant 0 : i32
    %c0_i32_0 = arith.constant 0 : i32
    %c0_i32_1 = arith.constant 0 : i32
    return %c0_i32, %c0_i32_0 : i32, i32
  }
  func.func @transform_4(%arg0: i32) -> (i32, i32) {
    %c0_i32 = arith.constant 0 : i32
    %c0_i32_0 = arith.constant 0 : i32
    %c0_i32_1 = arith.constant 0 : i32
    return %c0_i32, %c0_i32_0 : i32, i32
  }
  func.func @transform_5(%arg0: i32) -> (i32, i32) {
    %c0_i32 = arith.constant 0 : i32
    %c0_i32_0 = arith.constant 0 : i32
    %c0_i32_1 = arith.constant 0 : i32
    return %c0_i32, %c0_i32_0 : i32, i32
  }
  func.func @transform_6(%arg0: i32) -> (i32, i32) {
    %c0_i32 = arith.constant 0 : i32
    %c0_i32_0 = arith.constant 0 : i32
    %c0_i32_1 = arith.constant 0 : i32
    return %c0_i32, %c0_i32_0 : i32, i32
  }
  func.func @transform_7(%arg0: i32) -> (i32, i32) {
    %c0_i32 = arith.constant 0 : i32
    %c0_i32_0 = arith.constant 0 : i32
    %c0_i32_1 = arith.constant 0 : i32
    return %c0_i32, %c0_i32_0 : i32, i32
  }
  func.func @transform_8(%arg0: i32) -> (i32, i32) {
    %c0_i32 = arith.constant 0 : i32
    %c0_i32_0 = arith.constant 0 : i32
    return %arg0, %c0_i32 : i32, i32
  }
}

</mosaic_0001>

<bundles_post_ra>
// kernel: tpu_custom_call.1
= control target key start
LH: loop header
LB: loop body
LE: loop exit
PB: predicated region body
PF: predicated region fallthrough
CT: control target
= control target key end

     0   :  { %13 = vsyncpa [#allocation3], 0  ;;  %s1634_s0 = inlined_call_operand.hbm [shape: f32[8,512], index: 0, kind: input, shape index: {}]   ;;  %s1635_s1 = inlined_call_operand.hbm [shape: f32[8,64], index: 1, kind: input, shape index: {}]   ;;  %s1636_s2 = inlined_call_operand.hbm [shape: f32[8,512], index: 2, kind: input, shape index: {}]   ;;  %s1637_s3 = inlined_call_operand.hbm [shape: f32[512,16], index: 3, kind: input, shape index: {}]   ;;  %s1638_s4 = inlined_call_operand.hbm [shape: f32[16,2], index: 4, kind: input, shape index: {}]   ;;  %s1639_s5 = inlined_call_operand.hbm [shape: f32[2,16], index: 5, kind: input, shape index: {}]   ;;  %s1640_s6 = inlined_call_operand.hbm [shape: f32[16,512], index: 6, kind: input, shape index: {}]   ;;  %s1641_s7 = inlined_call_operand.hbm [shape: f32[512,64], index: 7, kind: input, shape index: {}]   ;;  %s1642_s8 = inlined_call_operand.hbm [shape: f32[8,64], index: 8, kind: output, shape index: {}]  }
   0x1   :  { %14 = vsyncpa [#allocation6], 0 }
   0x2   :  { %15 = vsyncpa [#allocation9], 0 }
   0x3   :  { %16 = vsyncpa [#allocation12], 0 }
   0x4   :  { %17 = vsyncpa [#allocation15], 0 }
   0x5   :  { %18 = vsyncpa [#allocation4], 0  ;;  %s1431_s27 = smov [#allocation5]   ;;  %s1432_s29 = smov [#allocation8]  }
   0x6   :  { %s35_s28 = sshll.u32 %s1431_s27, 4  ;;  %s54_s30 = sshll.u32 %s1432_s29, 4  ;;  %s36_s28 = int_to_ptr.vmem [resolvable:$true] %s35_s28  ;;  %s1493_s30 = int_to_ptr.vmem [resolvable:$true] %s54_s30 }
   0x7   :  { %s1221_s11 = scalar_lea.hbm %s1635_s1, 128 }
   0x8   :  { %p1222_p0 = scmp.ne.s32.totalorder %s1635_s1, %s1221_s11  ;;  %p1225_p1 = scmp.lt.u32.totalorder %s1221_s11, %s1635_s1 }
   0xa   :  { %p1227_p2 = pnand %p1225_p1, %p1222_p0 }
   0xc   :  { %1230 = shalt.err (!%p1227_p2)
}
   0xd   :  { %s1231_s16 = scalar_lea.vmem %s36_s28, 128  ;;  %p1236_p4 = scmp.lt.s32.totalorder %s36_s28, %s36_s28 }
   0xe   :  { %p1232_p3 = scmp.ne.s32.totalorder %s36_s28, %s1231_s16  ;;  %p1237_p5 = scmp.lt.s32.totalorder %s1231_s16, %s1231_s16 }
  0x10   :  { %p1238_p6 = por %p1237_p5, %p1236_p4 }
  0x12   :  { %p1239_p7 = pnand %p1238_p6, %p1232_p3 }
  0x14   :  { %1242 = shalt.err (!%p1239_p7)
}
  0x15   :  { %38 = dma.hbm_to_vmem [thread:$0]  %s1635_s1, 128, %s36_s28, [#allocation6]  }
  0x16   :  { %s1243_s21 = scalar_lea.hbm %s1637_s3, 8192 }
  0x17   :  { %p1244_p8 = scmp.ne.s32.totalorder %s1637_s3, %s1243_s21  ;;  %p1247_p9 = scmp.lt.u32.totalorder %s1243_s21, %s1637_s3 }
  0x19   :  { %p1249_p10 = pnand %p1247_p9, %p1244_p8 }
  0x1b   :  { %1252 = shalt.err (!%p1249_p10)
}
  0x1c   :  { %s1253_s26 = scalar_lea.vmem %s1493_s30, 8192  ;;  %p1258_p12 = scmp.lt.s32.totalorder %s1493_s30, %s1493_s30 }
  0x1d   :  { %p1254_p11 = scmp.ne.s32.totalorder %s1493_s30, %s1253_s26  ;;  %p1259_p13 = scmp.lt.s32.totalorder %s1253_s26, %s1253_s26 }
  0x1f   :  { %p1260_p0 = por %p1259_p13, %p1258_p12 }
  0x21   :  { %p1261_p1 = pnand %p1260_p0, %p1254_p11 }
  0x23   :  { %1264 = shalt.err (!%p1261_p1)
}
  0x24   :  { %s1433_s1 = smov 128   ;;  %s1434_s27 = smov 8  }
  0x25   :  { %60 = dma.hbm_to_vmem [thread:$0]  %s1637_s3, 8192, %s1493_s30, [#allocation9], %s1433_s1, %s1433_s1, %s1434_s27  }
  0x26   :  { %s1435_s9 = smov [#allocation11]   ;;  %s1436_s11 = smov [#allocation2]  }
  0x27   :  { %s79_s10 = sshll.u32 %s1435_s9, 4  ;;  %s25_s12 = sshll.u32 %s1436_s11, 4  ;;  %s80_s10 = int_to_ptr.vmem [resolvable:$true] %s79_s10  ;;  %s26_s12 = int_to_ptr.vmem [resolvable:$true] %s25_s12 }
  0x28   :  { %s1265_s15 = scalar_lea.hbm %s1639_s5, 32 }
  0x29   :  { %p1266_p2 = scmp.ne.s32.totalorder %s1639_s5, %s1265_s15  ;;  %p1269_p3 = scmp.lt.u32.totalorder %s1265_s15, %s1639_s5 }
  0x2b   :  { %p1271_p4 = pnand %p1269_p3, %p1266_p2 }
  0x2d   :  { %1274 = shalt.err (!%p1271_p4)
}
  0x2e   :  { %s1275_s3 = scalar_lea.vmem %s80_s10, 32  ;;  %p1280_p6 = scmp.lt.s32.totalorder %s80_s10, %s80_s10 }
  0x2f   :  { %p1276_p5 = scmp.ne.s32.totalorder %s80_s10, %s1275_s3  ;;  %p1281_p7 = scmp.lt.s32.totalorder %s1275_s3, %s1275_s3 }
  0x31   :  { %p1282_p8 = por %p1281_p7, %p1280_p6 }
  0x33   :  { %p1283_p9 = pnand %p1282_p8, %p1276_p5 }
  0x35   :  { %1286 = shalt.err (!%p1283_p9)
}
  0x36   :  { %82 = dma.hbm_to_vmem [thread:$0]  %s1639_s5, 32, %s80_s10, [#allocation12]  }
  0x37   :  { %s1287_s23 = scalar_lea.hbm %s1634_s0, 512 }
  0x38   :  { %p1288_p10 = scmp.ne.s32.totalorder %s1634_s0, %s1287_s23  ;;  %p1291_p11 = scmp.lt.u32.totalorder %s1287_s23, %s1634_s0 }
  0x3a   :  { %p1293_p12 = pnand %p1291_p11, %p1288_p10 }
  0x3c   :  { %1296 = shalt.err (!%p1293_p12)
}
  0x3d   :  { %s1297_s29 = scalar_lea.vmem %s26_s12, 512  ;;  %p1302_p0 = scmp.lt.s32.totalorder %s26_s12, %s26_s12 }
  0x3e   :  { %p1298_p13 = scmp.ne.s32.totalorder %s26_s12, %s1297_s29  ;;  %p1303_p1 = scmp.lt.s32.totalorder %s1297_s29, %s1297_s29 }
  0x40   :  { %p1304_p2 = por %p1303_p1, %p1302_p0 }
  0x42   :  { %p1305_p3 = pnand %p1304_p2, %p1298_p13 }
  0x44   :  { %1308 = shalt.err (!%p1305_p3)
}
  0x45   :  { %28 = dma.hbm_to_vmem [thread:$0]  %s1634_s0, 512, %s26_s12, [#allocation3]  }
  0x46   :  { %s1437_s10 = smov [#allocation7]   ;;  %s1438_s13 = smov [#allocation10]  }
  0x47   :  { %s45_s11 = sshll.u32 %s1437_s10, 4  ;;  %s66_s14 = sshll.u32 %s1438_s13, 4  ;;  %s46_s11 = int_to_ptr.vmem [resolvable:$true] %s45_s11  ;;  %s1551_s14 = int_to_ptr.vmem [resolvable:$true] %s66_s14 }
  0x48   :  { %s1309_s17 = scalar_lea.hbm %s1636_s2, 512 }
  0x49   :  { %p1310_p4 = scmp.ne.s32.totalorder %s1636_s2, %s1309_s17  ;;  %p1313_p5 = scmp.lt.u32.totalorder %s1309_s17, %s1636_s2 }
  0x4b   :  { %p1315_p6 = pnand %p1313_p5, %p1310_p4 }
  0x4d   :  { %1318 = shalt.err (!%p1315_p6)
}
  0x4e   :  { %s1319_s0 = scalar_lea.vmem %s46_s11, 512  ;;  %p1324_p8 = scmp.lt.s32.totalorder %s46_s11, %s46_s11 }
  0x4f   :  { %p1320_p7 = scmp.ne.s32.totalorder %s46_s11, %s1319_s0  ;;  %p1325_p9 = scmp.lt.s32.totalorder %s1319_s0, %s1319_s0 }
  0x51   :  { %p1326_p10 = por %p1325_p9, %p1324_p8 }
  0x53   :  { %p1327_p11 = pnand %p1326_p10, %p1320_p7 }
  0x55   :  { %1330 = shalt.err (!%p1327_p11)
}
  0x56   :  { %48 = dma.hbm_to_vmem [thread:$0]  %s1636_s2, 512, %s46_s11, [#allocation6]  }
  0x57   :  { %s1331_s23 = scalar_lea.hbm %s1638_s4, 256 }
  0x58   :  { %p1332_p12 = scmp.ne.s32.totalorder %s1638_s4, %s1331_s23  ;;  %p1335_p13 = scmp.lt.u32.totalorder %s1331_s23, %s1638_s4 }
  0x5a   :  { %p1337_p0 = pnand %p1335_p13, %p1332_p12 }
  0x5c   :  { %1340 = shalt.err (!%p1337_p0)
}
  0x5d   :  { %s1341_s29 = scalar_lea.vmem %s1551_s14, 256  ;;  %p1346_p2 = scmp.lt.s32.totalorder %s1551_s14, %s1551_s14 }
  0x5e   :  { %p1342_p1 = scmp.ne.s32.totalorder %s1551_s14, %s1341_s29  ;;  %p1347_p3 = scmp.lt.s32.totalorder %s1341_s29, %s1341_s29 }
  0x60   :  { %p1348_p4 = por %p1347_p3, %p1346_p2 }
  0x62   :  { %p1349_p5 = pnand %p1348_p4, %p1342_p1 }
  0x64   :  { %1352 = shalt.err (!%p1349_p5)
}
  0x65   :  { %72 = dma.hbm_to_vmem [thread:$0]  %s1638_s4, 256, %s1551_s14, [#allocation9], %s1433_s1, %s1433_s1, %s1434_s27  }
  0x66   :  { %s1439_s9 = smov [#allocation13]   ;;  %s1353_s15 = scalar_lea.hbm %s1640_s6, 1024 }
  0x67   :  { %s88_s10 = sshll.u32 %s1439_s9, 4  ;;  %p1354_p6 = scmp.ne.s32.totalorder %s1640_s6, %s1353_s15  ;;  %s89_s10 = int_to_ptr.vmem [resolvable:$true] %s88_s10 }
  0x68   :  { %p1357_p7 = scmp.lt.u32.totalorder %s1353_s15, %s1640_s6 }
  0x6a   :  { %p1359_p8 = pnand %p1357_p7, %p1354_p6 }
  0x6c   :  { %1362 = shalt.err (!%p1359_p8)
}
  0x6d   :  { %s1363_s3 = scalar_lea.vmem %s89_s10, 1024  ;;  %p1368_p10 = scmp.lt.s32.totalorder %s89_s10, %s89_s10 }
  0x6e   :  { %p1364_p9 = scmp.ne.s32.totalorder %s89_s10, %s1363_s3  ;;  %p1369_p11 = scmp.lt.s32.totalorder %s1363_s3, %s1363_s3 }
  0x70   :  { %p1370_p12 = por %p1369_p11, %p1368_p10 }
  0x72   :  { %p1371_p13 = pnand %p1370_p12, %p1364_p9 }
  0x74   :  { %1374 = shalt.err (!%p1371_p13)
}
  0x75   :  { %s1440_s4 = smov 512   ;;  %s1441_s14 = smov 32  }
  0x76   :  { %94 = dma.hbm_to_vmem [thread:$0]  %s1640_s6, 1024, %s89_s10, [#allocation12], %s1440_s4, %s1440_s4, %s1441_s14  }
  0x77   :  { %s1442_s12 = smov [#allocation14]   ;;  %s1375_s23 = scalar_lea.hbm %s1641_s7, 8192 }
  0x78   :  { %s100_s20 = sshll.u32 %s1442_s12, 4  ;;  %p1376_p0 = scmp.ne.s32.totalorder %s1641_s7, %s1375_s23  ;;  %s101_s20 = int_to_ptr.vmem [resolvable:$true] %s100_s20 }
  0x79   :  { %p1379_p1 = scmp.lt.u32.totalorder %s1375_s23, %s1641_s7 }
  0x7b   :  { %p1381_p2 = pnand %p1379_p1, %p1376_p0 }
  0x7d   :  { %1384 = shalt.err (!%p1381_p2)
}
  0x7e   :  { %s1385_s29 = scalar_lea.vmem %s101_s20, 8192  ;;  %p1390_p4 = scmp.lt.s32.totalorder %s101_s20, %s101_s20 }
  0x7f   :  { %p1386_p3 = scmp.ne.s32.totalorder %s101_s20, %s1385_s29  ;;  %p1391_p5 = scmp.lt.s32.totalorder %s1385_s29, %s1385_s29 }
  0x81   :  { %p1392_p6 = por %p1391_p5, %p1390_p4 }
  0x83   :  { %p1393_p7 = pnand %p1392_p6, %p1386_p3 }
  0x85   :  { %1396 = shalt.err (!%p1393_p7)
}
  0x86   :  { %106 = dma.hbm_to_vmem [thread:$0]  %s1641_s7, 8192, %s101_s20, [#allocation15], %s1433_s1, %s1433_s1, %s1434_s27  }
  0x87   :  { %1419 = dma.done.wait [#allocation3], 512  }
  0x88   :  { %1420 = vsyncadd [#allocation3], 4294966784 }
  0x89   :  { %1421 = dma.done.wait [#allocation6], 640  }
  0x8a   :  { %1422 = vsyncadd [#allocation6], 4294966656 }
  0x8b   :  { %1423 = dma.done.wait [#allocation9], 8448  }
  0x8c   :  { %1424 = vsyncadd [#allocation9], 4294958848 }
  0x8d   :  { %1425 = dma.done.wait [#allocation12], 1056  }
  0x8e   :  { %1426 = vsyncadd [#allocation12], 4294966240 }
  0x8f   :  { %1427 = dma.done.wait [#allocation15], 8192  }
  0x90   :  { %1428 = vsyncadd [#allocation15], 4294959104  ;;  %v1612_v0 = vld [vmem:[#allocation5] sm:$0xff]  ;;  %v162_v1 = vld [vmem:[#allocation8 + $0x80] sm:$0xff]  ;;  %s1443_s5 = smov 64   ;;  %vm136_vm0 = vcmask 523264  }
  0x91   :  { %v163_v2 = vld [vmem:[#allocation8 + $0x88] sm:$0xff]  ;;  %133 = vrot.lane.b32.xlu0 %v1612_v0, %s1443_s5  ;;  %v194_v4 = vld [vmem:[#allocation8 + $0x180] sm:$0xff]  ;;  %v164_v13 = vld [vmem:[#allocation8 + $0x90] sm:$0xff]  ;;  %vm350_vm1 = vcmask 130048   ;;  %vm1445_vm2 = vmmov 0   ;;  %vm439_vm3 = vcmask 1041408  }
  0x92   :  { %v1061_v3 = vpack.c.bf16 %v163_v2, %v162_v1  ;;  %v195_v5 = vld [vmem:[#allocation8 + $0x188] sm:$0xff]  ;;  %v146_v6 = vld [vmem:[#allocation8] sm:$0xff]  ;;  %v165_v14 = vld [vmem:[#allocation8 + $0x98] sm:$0xff]  ;;  %vm435_vm4 = vcmask 15360   ;;  %s1447_s7 = smov [#allocation16]  }
  0x93   :  { %v1093_v7 = vpack.c.bf16 %v195_v5, %v194_v4  ;;  %v147_v8 = vld [vmem:[#allocation8 + $0x8] sm:$0xff]  ;;  %v178_v9 = vld [vmem:[#allocation8 + $0x100] sm:$0xff]  ;;  %v196_v15 = vld [vmem:[#allocation8 + $0x190] sm:$0xff]  ;;  %v1065_v16 = vpack.c.bf16 %v165_v14, %v164_v13  ;;  %s886_s1 = sshll.u32 %s1447_s7, 4  ;;  %s887_s1 = int_to_ptr.vmem [resolvable:$true] %s886_s1 }
  0x94   :  { %v179_v10 = vld [vmem:[#allocation8 + $0x108] sm:$0xff]  ;;  %1062 = vmatprep.subr.bf16.mxu0 %v1061_v3  ;;  %v1063_v11 = vpack.c.bf16 %v147_v8, %v146_v6  ;;  %v197_v17 = vld [vmem:[#allocation8 + $0x198] sm:$0xff]  ;;  %v148_v18 = vld [vmem:[#allocation8 + $0x10] sm:$0xff]  ;;  %s1397_s27 = scalar_lea.vmem %s887_s1, 128  ;;  %p1402_p9 = scmp.lt.s32.totalorder %s887_s1, %s887_s1 }
  0x95   :  { %v1095_v12 = vpack.c.bf16 %v179_v10, %v178_v9  ;;  %1094 = vmatprep.subr.bf16.mxu1 %v1093_v7  ;;  %v149_v19 = vld [vmem:[#allocation8 + $0x18] sm:$0xff]  ;;  %v1097_v20 = vpack.c.bf16 %v197_v17, %v196_v15  ;;  %v180_v22 = vld [vmem:[#allocation8 + $0x110] sm:$0xff]  ;;  %v166_v24 = vld [vmem:[#allocation8 + $0xa0] sm:$0xff]  ;;  %p1398_p8 = scmp.ne.s32.totalorder %s887_s1, %s1397_s27  ;;  %p1403_p10 = scmp.lt.s32.totalorder %s1397_s27, %s1397_s27 }
  0x96   :  { %1064 = vmatpush3.bf16.msra.mxu0 %v1063_v11  ;;  %v1067_v21 = vpack.c.bf16 %v149_v19, %v148_v18  ;;  %v181_v23 = vld [vmem:[#allocation8 + $0x118] sm:$0xff]  ;;  %v167_v26 = vld [vmem:[#allocation8 + $0xa8] sm:$0xff]  ;;  %v198_v27 = vld [vmem:[#allocation8 + $0x1a0] sm:$0xff] }
  0x97   :  { %1096 = vmatpush3.bf16.msra.mxu1 %v1095_v12  ;;  %1066 = vmatprep.subr.bf16.mxu0 %v1065_v16  ;;  %v1099_v25 = vpack.c.bf16 %v181_v23, %v180_v22  ;;  %v199_v28 = vld [vmem:[#allocation8 + $0x1a8] sm:$0xff]  ;;  %v1069_v29 = vpack.c.bf16 %v167_v26, %v166_v24  ;;  %v150_v31 = vld [vmem:[#allocation8 + $0x20] sm:$0xff]  ;;  %v168_v35 = vld [vmem:[#allocation8 + $0xb0] sm:$0xff]  ;;  %p1404_p11 = por %p1403_p10, %p1402_p9 }
  0x98   :  { %1098 = vmatprep.subr.bf16.mxu1 %v1097_v20  ;;  %v1101_v30 = vpack.c.bf16 %v199_v28, %v198_v27  ;;  %v151_v32 = vld [vmem:[#allocation8 + $0x28] sm:$0xff]  ;;  %v182_v33 = vld [vmem:[#allocation8 + $0x120] sm:$0xff]  ;;  %v169_v36 = vld [vmem:[#allocation8 + $0xb8] sm:$0xff] }
  0x99   :  { %v183_v34 = vld [vmem:[#allocation8 + $0x128] sm:$0xff]  ;;  %v1071_v37 = vpack.c.bf16 %v151_v32, %v150_v31  ;;  %v200_v39 = vld [vmem:[#allocation8 + $0x1b0] sm:$0xff]  ;;  %v201_v40 = vld [vmem:[#allocation8 + $0x1b8] sm:$0xff]  ;;  %v1073_v42 = vpack.c.bf16 %v169_v36, %v168_v35  ;;  %p1405_p12 = pnand %p1404_p11, %p1398_p8 }
  0x9a   :  { %1068 = vmatpush3.bf16.msra.mxu0 %v1067_v21  ;;  %v1103_v38 = vpack.c.bf16 %v183_v34, %v182_v33  ;;  %v152_v41 = vld [vmem:[#allocation8 + $0x30] sm:$0xff]  ;;  %v1105_v43 = vpack.c.bf16 %v201_v40, %v200_v39  ;;  %v153_v44 = vld [vmem:[#allocation8 + $0x38] sm:$0xff]  ;;  %v170_v47 = vld [vmem:[#allocation8 + $0xc0] sm:$0xff] }
  0x9b   :  { %1100 = vmatpush3.bf16.msra.mxu1 %v1099_v25  ;;  %1070 = vmatprep.subr.bf16.mxu0 %v1069_v29  ;;  %v184_v45 = vld [vmem:[#allocation8 + $0x130] sm:$0xff]  ;;  %v185_v46 = vld [vmem:[#allocation8 + $0x138] sm:$0xff]  ;;  %v171_v48 = vld [vmem:[#allocation8 + $0xc8] sm:$0xff]  ;;  %v1075_v51 = vpack.c.bf16 %v153_v44, %v152_v41 }
  0x9c   :  { %1102 = vmatprep.subr.bf16.mxu1 %v1101_v30  ;;  %v202_v49 = vld [vmem:[#allocation8 + $0x1c0] sm:$0xff]  ;;  %v203_v50 = vld [vmem:[#allocation8 + $0x1c8] sm:$0xff]  ;;  %v1107_v52 = vpack.c.bf16 %v185_v46, %v184_v45  ;;  %v1077_v55 = vpack.c.bf16 %v171_v48, %v170_v47  ;;  %v172_v59 = vld [vmem:[#allocation8 + $0xd0] sm:$0xff] }
  0x9d   :  { %v154_v53 = vld [vmem:[#allocation8 + $0x40] sm:$0xff]  ;;  %v155_v54 = vld [vmem:[#allocation8 + $0x48] sm:$0xff]  ;;  %v1109_v56 = vpack.c.bf16 %v203_v50, %v202_v49  ;;  %v173_v60 = vld [vmem:[#allocation8 + $0xd8] sm:$0xff] }
  0x9e   :  { %1072 = vmatpush3.bf16.msra.mxu0 %v1071_v37  ;;  %v186_v57 = vld [vmem:[#allocation8 + $0x140] sm:$0xff]  ;;  %v187_v58 = vld [vmem:[#allocation8 + $0x148] sm:$0xff]  ;;  %v204_v61 = vld [vmem:[#allocation8 + $0x1d0] sm:$0xff]  ;;  %v1079_v63 = vpack.c.bf16 %v155_v54, %v154_v53  ;;  %v1081_v4 = vpack.c.bf16 %v173_v60, %v172_v59  ;;  %v1444_v53 = vmov 0.0|0.0  }
  0x9f   :  { %1104 = vmatpush3.bf16.msra.mxu1 %v1103_v38  ;;  %1074 = vmatprep.subr.bf16.mxu0 %v1073_v42  ;;  %v205_v62 = vld [vmem:[#allocation8 + $0x1d8] sm:$0xff]  ;;  %v1111_v1 = vpack.c.bf16 %v187_v58, %v186_v57  ;;  %v156_v2 = vld [vmem:[#allocation8 + $0x50] sm:$0xff]  ;;  %v174_v8 = vld [vmem:[#allocation8 + $0xe0] sm:$0xff] }
  0xa0   :  { %1106 = vmatprep.subr.bf16.mxu1 %v1105_v43  ;;  %v157_v3 = vld [vmem:[#allocation8 + $0x58] sm:$0xff]  ;;  %v1113_v5 = vpack.c.bf16 %v205_v62, %v204_v61  ;;  %v188_v6 = vld [vmem:[#allocation8 + $0x150] sm:$0xff]  ;;  %v175_v9 = vld [vmem:[#allocation8 + $0xe8] sm:$0xff] }
  0xa1   :  { %v189_v7 = vld [vmem:[#allocation8 + $0x158] sm:$0xff]  ;;  %v206_v10 = vld [vmem:[#allocation8 + $0x1e0] sm:$0xff]  ;;  %v207_v11 = vld [vmem:[#allocation8 + $0x1e8] sm:$0xff]  ;;  %v1083_v12 = vpack.c.bf16 %v157_v3, %v156_v2  ;;  %v1085_v16 = vpack.c.bf16 %v175_v9, %v174_v8 }
  0xa2   :  { %1076 = vmatpush3.bf16.msra.mxu0 %v1075_v51  ;;  %v1115_v13 = vpack.c.bf16 %v189_v7, %v188_v6  ;;  %v158_v14 = vld [vmem:[#allocation8 + $0x60] sm:$0xff]  ;;  %v159_v15 = vld [vmem:[#allocation8 + $0x68] sm:$0xff]  ;;  %v1117_v17 = vpack.c.bf16 %v207_v11, %v206_v10  ;;  %v176_v20 = vld [vmem:[#allocation8 + $0xf0] sm:$0xff] }
  0xa3   :  { %1108 = vmatpush3.bf16.msra.mxu1 %v1107_v52  ;;  %1078 = vmatprep.subr.bf16.mxu0 %v1077_v55  ;;  %v190_v18 = vld [vmem:[#allocation8 + $0x160] sm:$0xff]  ;;  %v191_v19 = vld [vmem:[#allocation8 + $0x168] sm:$0xff]  ;;  %v177_v21 = vld [vmem:[#allocation8 + $0xf8] sm:$0xff]  ;;  %v1087_v24 = vpack.c.bf16 %v159_v15, %v158_v14  ;;  %v1446_v55 = vmov 0.0  }
  0xa4   :  { %1110 = vmatprep.subr.bf16.mxu1 %v1109_v56  ;;  %v208_v22 = vld [vmem:[#allocation8 + $0x1f0] sm:$0xff]  ;;  %v209_v23 = vld [vmem:[#allocation8 + $0x1f8] sm:$0xff]  ;;  %v1119_v25 = vpack.c.bf16 %v191_v19, %v190_v18  ;;  %v1089_v27 = vpack.c.bf16 %v177_v21, %v176_v20  ;;  %v139_v34 = vld [vmem:[#allocation2 + $0x8] sm:$0xff] }
  0xa5   :  { %v160_v26 = vld [vmem:[#allocation8 + $0x70] sm:$0xff]  ;;  %v1121_v28 = vpack.c.bf16 %v209_v23, %v208_v22  ;;  %v161_v29 = vld [vmem:[#allocation8 + $0x78] sm:$0xff]  ;;  %v140_v37 = vld [vmem:[#allocation2 + $0x10] sm:$0xff] }
  0xa6   :  { %1080 = vmatpush3.bf16.msra.mxu0 %v1079_v63  ;;  %v192_v30 = vld [vmem:[#allocation8 + $0x170] sm:$0xff]  ;;  %v193_v31 = vld [vmem:[#allocation8 + $0x178] sm:$0xff]  ;;  %v1091_v32 = vpack.c.bf16 %v161_v29, %v160_v26  ;;  %v359_v52 = vld [vmem:[#allocation10 + $0x8] sm:$0xff] }
  0xa7   :  { %1112 = vmatpush3.bf16.msra.mxu1 %v1111_v1  ;;  %1082 = vmatprep.subr.bf16.mxu0 %v1081_v4  ;;  %v1123_v33 = vpack.c.bf16 %v193_v31, %v192_v30  ;;  %v141_v35 = vld [vmem:[#allocation2 + $0x18] sm:$0xff]  ;;  %v138_v36 = vld [vmem:[#allocation2] sm:$0xff]  ;;  %v516_v10 = vld [vmem:[#allocation13 + $0x10] sm:$0xff] }
  0xa8   :  { %1114 = vmatprep.subr.bf16.mxu1 %v1113_v5  ;;  %v434_v61 = vld [vmem:[#allocation11] sm:$0x3]  ;;  %v515_v62 = vld [vmem:[#allocation13 + $0x8] sm:$0xff]  ;;  %v514_v4 = vld [vmem:[#allocation13] sm:$0xff] }
  0xa9   :  { %v519_v63 = vld [vmem:[#allocation13 + $0x28] sm:$0xff]  ;;  %v517_v1 = vld [vmem:[#allocation13 + $0x18] sm:$0xff]  ;;  %v518_v5 = vld [vmem:[#allocation13 + $0x20] sm:$0xff] }
  0xaa   :  { %1084 = vmatpush3.bf16.msra.mxu0 %v1083_v12  ;;  %v1128_v2 = vpack.c.bf16 %v519_v63, %v515_v62  ;;  %v521_v3 = vld [vmem:[#allocation13 + $0x38] sm:$0xff]  ;;  %v1130_v7 = vpack.c.bf16 %v518_v5, %v514_v4  ;;  %v520_v11 = vld [vmem:[#allocation13 + $0x30] sm:$0xff]  ;;  %v691_v14 = vld [vmem:[#allocation14 + $0x80] sm:$0xff] }
  0xab   :  { %1116 = vmatpush3.bf16.msra.mxu1 %v1115_v13  ;;  %1086 = vmatprep.subr.bf16.mxu0 %v1085_v16  ;;  %v1132_v6 = vpack.c.bf16 %v521_v3, %v517_v1  ;;  %v1134_v12 = vpack.c.bf16 %v520_v11, %v516_v10  ;;  %v692_v15 = vld [vmem:[#allocation14 + $0x88] sm:$0xff]  ;;  %v723_v16 = vld [vmem:[#allocation14 + $0x180] sm:$0xff]  ;;  %v725_v26 = vld [vmem:[#allocation14 + $0x190] sm:$0xff] }
  0xac   :  { %1118 = vmatprep.subr.bf16.mxu1 %v1117_v17  ;;  %v1136_v17 = vpack.c.bf16 %v692_v15, %v691_v14  ;;  %v724_v18 = vld [vmem:[#allocation14 + $0x188] sm:$0xff]  ;;  %v675_v20 = vld [vmem:[#allocation14] sm:$0xff]  ;;  %v677_v31 = vld [vmem:[#allocation14 + $0x10] sm:$0xff] }
  0xad   :  { %v1168_v19 = vpack.c.bf16 %v724_v18, %v723_v16  ;;  %v676_v21 = vld [vmem:[#allocation14 + $0x8] sm:$0xff]  ;;  %v707_v22 = vld [vmem:[#allocation14 + $0x100] sm:$0xff]  ;;  %v701_v11 = vld [vmem:[#allocation14 + $0xd0] sm:$0xff] }
  0xae   :  { %1088 = vmatpush3.bf16.msra.mxu0 %v1087_v24  ;;  %v708_v23 = vld [vmem:[#allocation14 + $0x108] sm:$0xff]  ;;  %v693_v24 = vld [vmem:[#allocation14 + $0x90] sm:$0xff]  ;;  %v1138_v29 = vpack.c.bf16 %v676_v21, %v675_v20  ;;  %v699_v62 = vld [vmem:[#allocation14 + $0xc0] sm:$0xff] }
  0xaf   :  { %1120 = vmatpush3.bf16.msra.mxu1 %v1119_v25  ;;  %1090 = vmatprep.subr.bf16.mxu0 %v1089_v27  ;;  %v694_v25 = vld [vmem:[#allocation14 + $0x98] sm:$0xff]  ;;  %v1170_v30 = vpack.c.bf16 %v708_v23, %v707_v22  ;;  %v700_v63 = vld [vmem:[#allocation14 + $0xc8] sm:$0xff]  ;;  %v731_v1 = vld [vmem:[#allocation14 + $0x1c0] sm:$0xff] }
  0xb0   :  { %1122 = vmatprep.subr.bf16.mxu1 %v1121_v28  ;;  %v726_v27 = vld [vmem:[#allocation14 + $0x198] sm:$0xff]  ;;  %v683_v5 = vld [vmem:[#allocation14 + $0x40] sm:$0xff]  ;;  %v716_v10 = vld [vmem:[#allocation14 + $0x148] sm:$0xff] }
  0xb1   :  { %v734_v14 = vld [vmem:[#allocation14 + $0x1d8] sm:$0xff]  ;;  %v717_v21 = vld [vmem:[#allocation14 + $0x150] sm:$0xff]  ;;  %v703_v23 = vld [vmem:[#allocation14 + $0xe0] sm:$0xff] }
  0xb2   :  { %1092 = vmatpush3.bf16.msra.mxu0 %v1091_v32  ;;  %v678_v32 = vld [vmem:[#allocation14 + $0x18] sm:$0xff] }
  0xb3   :  { %1124 = vmatpush3.bf16.msra.mxu1 %v1123_v33  ;;  %1125 = vmatprep.subr.bf16.mxu0 %v1444_v53  ;;  %v730_v53 = vld [vmem:[#allocation14 + $0x1b8] sm:$0xff] }
  0xb4   :  { %1056 = vmatprep.subr.mxu1 %v1446_v55  ;;  %v686_v18 = vld [vmem:[#allocation14 + $0x58] sm:$0xff] }
  0xb5   :  { %v718_v22 = vld [vmem:[#allocation14 + $0x158] sm:$0xff] }
 0x103   :  { %v134_v38 = vpop.permute.xlu0 %133 }
 0x104   :  { %v137_v39 = vsel %vm136_vm0, %v1612_v0, %v134_v38  ;;  %v358_v0 = vld [vmem:[#allocation10] sm:$0xff]  ;;  %v710_v38 = vld [vmem:[#allocation14 + $0x118] sm:$0xff] }
 0x105   :  { %v143_v40 = vmul.f32 %v139_v34, %v137_v39  ;;  %v145_v41 = vmul.f32 %v141_v35, %v137_v39  ;;  %v142_v42 = vmul.f32 %v138_v36, %v137_v39  ;;  %v144_v43 = vmul.f32 %v140_v37, %v137_v39  ;;  %v709_v37 = vld [vmem:[#allocation14 + $0x110] sm:$0xff]  ;;  %v695_v39 = vld [vmem:[#allocation14 + $0xa0] sm:$0xff] }
 0x106   :  { %v1126_v54 = vpack.c.bf16 %v359_v52, %v358_v0  ;;  %v1140_v35 = vpack.c.bf16 %v694_v25, %v693_v24  ;;  %v1172_v36 = vpack.c.bf16 %v726_v27, %v725_v26  ;;  %v698_v0 = vld [vmem:[#allocation14 + $0xb8] sm:$0xff]  ;;  %v729_v52 = vld [vmem:[#allocation14 + $0x1b0] sm:$0xff]  ;;  %v704_v24 = vld [vmem:[#allocation14 + $0xe8] sm:$0xff] }
 0x107   :  { %274 = vmatprep.mubr.f32.mxu0 %v143_v40  ;;  %344 = vmatprep.mubr.f32.mxu1 %v145_v41  ;;  %v696_v40 = vld [vmem:[#allocation14 + $0xa8] sm:$0xff]  ;;  %v727_v41 = vld [vmem:[#allocation14 + $0x1a0] sm:$0xff] }
 0x108   :  { %275 = vmatmul.mubr.f32.vlgmr.msra.gmra.mrb[0].mxu0 %v142_v42  ;;  %345 = vmatmul.mubr.f32.vlgmr.msra.gmra.mrb[0].mxu1 %v144_v43  ;;  %v728_v42 = vld [vmem:[#allocation14 + $0x1a8] sm:$0xff]  ;;  %v1142_v43 = vpack.c.bf16 %v678_v32, %v677_v31  ;;  %v735_v25 = vld [vmem:[#allocation14 + $0x1e0] sm:$0xff] }
 0x109   :  { %1053 = vmatprep.mubr.msk.f32.mxu0 %vm1445_vm2, %v1446_v55  ;;  %1058 = vmatprep.mubr.msk.f32.mxu1 %vm1445_vm2, %v1446_v55  ;;  %v736_v26 = vld [vmem:[#allocation14 + $0x1e8] sm:$0xff] }
 0x10a   :  { %1127 = vmatpush3.bf16.msra.mxu0 %v1126_v54  ;;  %1057 = vmatpush3.msk.msra.mxu1 %vm439_vm3, %v434_v61  ;;  %v714_v61 = vld [vmem:[#allocation14 + $0x138] sm:$0xff]  ;;  %v1192_v31 = vpack.c.bf16 %v736_v26, %v735_v25  ;;  %v688_v32 = vld [vmem:[#allocation14 + $0x68] sm:$0xff] }
 0x10b   :  { %1129 = vmatprep.subr.bf16.mxu0 %v1128_v2  ;;  %1133 = vmatprep.subr.bf16.mxu1 %v1132_v6  ;;  %v732_v2 = vld [vmem:[#allocation14 + $0x1c8] sm:$0xff] }
 0x10c   :  { %v684_v6 = vld [vmem:[#allocation14 + $0x48] sm:$0xff] }
 0x10d   :  { %v1154_v15 = vpack.c.bf16 %v684_v6, %v683_v5 }
 0x1db   :  { %v936_v44 = vpop.f32.mrb[0].mxu0  ;;  %v971_v45 = vpop.f32.mrb[0].mxu1 }
 0x1dc   :  { %v937_v46 = vpop.f32.mrb[1].mxu0  ;;  %v972_v47 = vpop.f32.mrb[1].mxu1 }
 0x1dd   :  { %v938_v48 = vadd.f32 %v937_v46, %v936_v44  ;;  %v973_v49 = vadd.f32 %v972_v47, %v971_v45  ;;  %v1174_v44 = vpack.c.bf16 %v710_v38, %v709_v37  ;;  %v679_v45 = vld [vmem:[#allocation14 + $0x20] sm:$0xff]  ;;  %v680_v46 = vld [vmem:[#allocation14 + $0x28] sm:$0xff]  ;;  %v1144_v47 = vpack.c.bf16 %v696_v40, %v695_v39  ;;  %v705_v37 = vld [vmem:[#allocation14 + $0xf0] sm:$0xff] }
 0x1de   :  { %v1146_v54 = vpack.c.bf16 %v680_v46, %v679_v45  ;;  %v706_v38 = vld [vmem:[#allocation14 + $0xf8] sm:$0xff]  ;;  %v737_v39 = vld [vmem:[#allocation14 + $0x1f0] sm:$0xff] }
 0x1df   :  { %v347_v50 = vadd.f32 %v973_v49, %v938_v48  ;;  %v1176_v48 = vpack.c.bf16 %v728_v42, %v727_v41  ;;  %v711_v49 = vld [vmem:[#allocation14 + $0x120] sm:$0xff]  ;;  %v1164_v40 = vpack.c.bf16 %v706_v38, %v705_v37  ;;  %v738_v41 = vld [vmem:[#allocation14 + $0x1f8] sm:$0xff]  ;;  %v689_v42 = vld [vmem:[#allocation14 + $0x70] sm:$0xff] }
 0x1e0   :  { %v721_v46 = vld [vmem:[#allocation14 + $0x170] sm:$0xff] }
 0x1e1   :  { %v351_v51 = vsel %vm350_vm1, %v347_v50, -inf }
 0x1e2   :  { %352 = vmax.xlane.f32.xlu0 %v351_v51  ;;  %v697_v51 = vld [vmem:[#allocation14 + $0xb0] sm:$0xff] }
 0x26f   :  { %v353_v56 = vpop.xlane.xlu0 %352 }
 0x270   :  { %v354_v57 = vsub.f32 %v347_v50, %v353_v56  ;;  %v712_v50 = vld [vmem:[#allocation14 + $0x128] sm:$0xff]  ;;  %v681_v56 = vld [vmem:[#allocation14 + $0x30] sm:$0xff] }
 0x272   :  { %v355_v58 = vmax.f32 %v354_v57, -80.0  ;;  %v682_v57 = vld [vmem:[#allocation14 + $0x38] sm:$0xff] }
 0x273   :  { %v1150_v3 = vpack.c.bf16 %v682_v57, %v681_v56 }
 0x274   :  { %v356_v59 = vmul.f32 1.442695, %v355_v58  ;;  %v1148_v58 = vpack.c.bf16 %v698_v0, %v697_v51  ;;  %v667_v0 = vld [vmem:[#allocation7] sm:$0xff] }
 0x276   :  { %1217 = vpow2.f32 %v356_v59  ;;  %v1180_v59 = vpack.c.bf16 %v730_v53, %v729_v52  ;;  %v669_v53 = vld [vmem:[#allocation7 + $0x10] sm:$0xff] }
 0x280   :  { %v1218_v60 = vpop.eup %1217 }
 0x281   :  { %1054 = vmatmul.mubr.msk.f32.vlgmr.msra.gmra.mrb[2].mxu0 %vm350_vm1, %v1218_v60 }
 0x282   :  { %589 = vmatprep.mubr.f32.mxu0 %v1446_v55  ;;  %1131 = vmatpush1.bf16.msra.mxu0 %v1130_v7  ;;  %v1152_v7 = vpack.c.bf16 %v700_v63, %v699_v62 }
 0x283   :  { %1137 = vmatprep.subr.bf16.mxu0 %v1136_v17  ;;  %v685_v17 = vld [vmem:[#allocation14 + $0x50] sm:$0xff] }
 0x284   :  { %v1158_v27 = vpack.c.bf16 %v686_v18, %v685_v17 }
 0x354   :  { %v429_v8 = vpop.f32.mrb[2].mxu0 }
 0x355   :  { %1219 = vrcp.f32 %v429_v8  ;;  %v1055_v9 = vpop.f32.mrb[3].mxu0  ;;  %v1184_v8 = vpack.c.bf16 %v732_v2, %v731_v1 }
 0x356   :  { %v715_v9 = vld [vmem:[#allocation14 + $0x140] sm:$0xff] }
 0x357   :  { %v1186_v16 = vpack.c.bf16 %v716_v10, %v715_v9 }
 0x35f   :  { %v1220_v13 = vpop.eup %1219 }
 0x360   :  { %1059 = vmatmul.mubr.msk.f32.vlgmr.msra.gmra.mrb[2].mxu1 %vm435_vm4, %v1220_v13  ;;  %v733_v13 = vld [vmem:[#allocation14 + $0x1d0] sm:$0xff] }
 0x361   :  { %1135 = vmatpush1.bf16.msra.mxu1 %v1134_v12  ;;  %660 = vmatprep.mubr.f32.mxu1 %v1446_v55  ;;  %v1178_v55 = vpack.c.bf16 %v712_v50, %v711_v49  ;;  %v702_v12 = vld [vmem:[#allocation14 + $0xd8] sm:$0xff]  ;;  %v1188_v20 = vpack.c.bf16 %v734_v14, %v733_v13  ;;  %v670_v50 = vld [vmem:[#allocation7 + $0x18] sm:$0xff] }
 0x362   :  { %1169 = vmatprep.subr.bf16.mxu1 %v1168_v19  ;;  %v1156_v19 = vpack.c.bf16 %v702_v12, %v701_v11  ;;  %v668_v49 = vld [vmem:[#allocation7 + $0x8] sm:$0xff] }
 0x433   :  { %v509_v28 = vpop.f32.mrb[2].mxu1 }
 0x434   :  { %v513_v33 = vmul.f32 %v1218_v60, %v509_v28  ;;  %v1060_v34 = vpop.f32.mrb[3].mxu1  ;;  %v713_v60 = vld [vmem:[#allocation14 + $0x130] sm:$0xff]  ;;  %v1190_v28 = vpack.c.bf16 %v718_v22, %v717_v21 }
 0x435   :  { %v1182_v4 = vpack.c.bf16 %v714_v61, %v713_v60  ;;  %v720_v34 = vld [vmem:[#allocation14 + $0x168] sm:$0xff] }
 0x436   :  { %902 = vmatmul.mubr.msk.f32.vlgmr.msra.gmra.mrb[4].mxu0 %vm350_vm1, %v513_v33  ;;  %903 = vmatmul.mubr.msk.f32.vlgmr.msra.gmra.mrb[4].mxu1 %vm350_vm1, %v513_v33  ;;  %v719_v33 = vld [vmem:[#allocation14 + $0x160] sm:$0xff] }
 0x437   :  { %1139 = vmatpush3.bf16.msra.mxu0 %v1138_v29  ;;  %1171 = vmatpush3.bf16.msra.mxu1 %v1170_v30  ;;  %v687_v29 = vld [vmem:[#allocation14 + $0x60] sm:$0xff]  ;;  %v1160_v30 = vpack.c.bf16 %v704_v24, %v703_v23 }
 0x438   :  { %1141 = vmatprep.subr.bf16.mxu0 %v1140_v35  ;;  %1173 = vmatprep.subr.bf16.mxu1 %v1172_v36  ;;  %v1162_v35 = vpack.c.bf16 %v688_v32, %v687_v29  ;;  %v1194_v36 = vpack.c.bf16 %v720_v34, %v719_v33 }
 0x43b   :  { %1143 = vmatpush3.bf16.msra.mxu0 %v1142_v43  ;;  %1175 = vmatpush3.bf16.msra.mxu1 %v1174_v44  ;;  %v690_v43 = vld [vmem:[#allocation14 + $0x78] sm:$0xff]  ;;  %v1196_v44 = vpack.c.bf16 %v738_v41, %v737_v39 }
 0x43c   :  { %1145 = vmatprep.subr.bf16.mxu0 %v1144_v47  ;;  %1177 = vmatprep.subr.bf16.mxu1 %v1176_v48  ;;  %v1166_v45 = vpack.c.bf16 %v690_v43, %v689_v42  ;;  %v722_v47 = vld [vmem:[#allocation14 + $0x178] sm:$0xff] }
 0x43d   :  { %v1198_v48 = vpack.c.bf16 %v722_v47, %v721_v46 }
 0x43f   :  { %1147 = vmatpush3.bf16.msra.mxu0 %v1146_v54  ;;  %1179 = vmatpush3.bf16.msra.mxu1 %v1178_v55 }
 0x440   :  { %1149 = vmatprep.subr.bf16.mxu0 %v1148_v58  ;;  %1181 = vmatprep.subr.bf16.mxu1 %v1180_v59 }
 0x443   :  { %1151 = vmatpush3.bf16.msra.mxu0 %v1150_v3  ;;  %1183 = vmatpush3.bf16.msra.mxu1 %v1182_v4 }
 0x444   :  { %1153 = vmatprep.subr.bf16.mxu0 %v1152_v7  ;;  %1185 = vmatprep.subr.bf16.mxu1 %v1184_v8 }
 0x447   :  { %1155 = vmatpush3.bf16.msra.mxu0 %v1154_v15  ;;  %1187 = vmatpush3.bf16.msra.mxu1 %v1186_v16 }
 0x448   :  { %1157 = vmatprep.subr.bf16.mxu0 %v1156_v19  ;;  %1189 = vmatprep.subr.bf16.mxu1 %v1188_v20 }
 0x44b   :  { %1159 = vmatpush3.bf16.msra.mxu0 %v1158_v27  ;;  %1191 = vmatpush3.bf16.msra.mxu1 %v1190_v28 }
 0x44c   :  { %1161 = vmatprep.subr.bf16.mxu0 %v1160_v30  ;;  %1193 = vmatprep.subr.bf16.mxu1 %v1192_v31 }
 0x44f   :  { %1163 = vmatpush3.bf16.msra.mxu0 %v1162_v35  ;;  %1195 = vmatpush3.bf16.msra.mxu1 %v1194_v36 }
 0x450   :  { %1165 = vmatprep.subr.bf16.mxu0 %v1164_v40  ;;  %1197 = vmatprep.subr.bf16.mxu1 %v1196_v44 }
 0x453   :  { %1167 = vmatpush3.bf16.msra.mxu0 %v1166_v45  ;;  %1199 = vmatpush3.bf16.msra.mxu1 %v1198_v48 }
 0x509   :  { %v591_v51 = vpop.f32.mrb[4].mxu0  ;;  %v662_v52 = vpop.f32.mrb[4].mxu1 }
 0x50a   :  { %v593_v54 = vpop.f32.mrb[5].mxu0  ;;  %v664_v55 = vpop.f32.mrb[5].mxu1  ;;  %v671_v58 = vmul.f32 %v667_v0, %v591_v51  ;;  %v673_v59 = vmul.f32 %v669_v53, %v662_v52 }
 0x50b   :  { %v672_v56 = vmul.f32 %v668_v49, %v593_v54  ;;  %v674_v57 = vmul.f32 %v670_v50, %v664_v55 }
 0x50d   :  { %803 = vmatprep.mubr.f32.mxu0 %v672_v56  ;;  %873 = vmatprep.mubr.f32.mxu1 %v674_v57 }
 0x50e   :  { %804 = vmatmul.mubr.f32.vlgmr.msra.gmra.mrb[6].mxu0 %v671_v58  ;;  %874 = vmatmul.mubr.f32.vlgmr.msra.gmra.mrb[6].mxu1 %v673_v59 }
 0x5e1   :  { %v1011_v60 = vpop.f32.mrb[6].mxu0  ;;  %v1046_v61 = vpop.f32.mrb[6].mxu1 }
 0x5e2   :  { %v1012_v62 = vpop.f32.mrb[7].mxu0  ;;  %v1047_v63 = vpop.f32.mrb[7].mxu1 }
 0x5e3   :  { %v1013_v1 = vadd.f32 %v1012_v62, %v1011_v60  ;;  %v1048_v2 = vadd.f32 %v1047_v63, %v1046_v61 }
 0x5e5   :  { %v876_v3 = vadd.f32 %v1048_v2, %v1013_v1 }
 0x5e7   :  { %879 = vst.msk [vmem:[#allocation16] sm:$0xff] %vm136_vm0, %v876_v3 }
 0x5e8   :  { %1408 = shalt.err (!%p1405_p12)
}
 0x5e9   :  { %s1409_s11 = scalar_lea.hbm %s1642_s8, 128 }
 0x5ea   :  { %p1410_p13 = scmp.ne.s32.totalorder %s1642_s8, %s1409_s11  ;;  %p1413_p0 = scmp.lt.u32.totalorder %s1409_s11, %s1642_s8 }
 0x5ec   :  { %p1415_p1 = pnand %p1413_p0, %p1410_p13 }
 0x5ee   :  { %1418 = shalt.err (!%p1415_p1)
}
 0x5ef   :  { %889 = dma.vmem_to_hbm [thread:$0]  %s887_s1, 128, %s1642_s8, [#allocation4]  }
 0x5f0   :  { %1429 = dma.done.wait [#allocation4], 128  }
 0x5f1   :  { %1430 = vsyncadd [#allocation4], 4294967168 }
 0x5f2   :  { %893 = vsyncpa [#allocation3], 1 }
 0x5f3   :  { %894 = vsyncpa [#allocation6], 1 }
 0x5f4   :  { %895 = vsyncpa [#allocation9], 1 }
 0x5f5   :  { %896 = vsyncpa [#allocation12], 1 }
 0x5f6   :  { %897 = vsyncpa [#allocation15], 1 }
 0x5f7   :  { %898 = vsyncpa [#allocation4], 1 }

</bundles_post_ra>
